<compile_context>
chip_gen: v7x
topology: tpu7x:2x2x1
jax: 0.10.0
libtpu: 0.0.40
codegen_flags: <defaults>
</compile_context>

<pallas_src>
import numpy as np
import jax
import jax.numpy as jnp
from jax.experimental import pallas as pl
from jax.experimental.pallas import tpu as pltpu

LANE = 128  # TPU lane width: output padded to this so stores are unmasked vst.


def _round_up(n, m):
    return ((n + m - 1) // m) * m


def _wdisc_kernel(x_ref, w1_ref, b1_ref, w2_ref, b2_ref, w3_ref, b3_ref, y_ref):
    """One batch tile: y = relu(relu(x@W1+b1)@W2+b2)@W3_pad + b3_pad."""
    x = x_ref[...]                                            # [TB, F] bf16

    # ad_layer1 + relu1 (dropout1 is identity at inference)
    h1 = jnp.dot(x, w1_ref[...], preferred_element_type=jnp.float32) + b1_ref[...]
    h1 = jnp.maximum(h1, 0.0)

    # ad_layer2 + relu2 (dropout2 is identity at inference)
    h2 = jnp.dot(h1.astype(w2_ref.dtype), w2_ref[...],
                 preferred_element_type=jnp.float32) + b2_ref[...]
    h2 = jnp.maximum(h2, 0.0)

    # ad_layer3 (no activation) — lane-padded to 128 wide for dense stores
    z = jnp.dot(h2.astype(w3_ref.dtype), w3_ref[...],
                preferred_element_type=jnp.float32) + b3_ref[...]
    y_ref[...] = z.astype(y_ref.dtype)                        # [TB, LANE]


def wasserstein_discriminator_forward(x, params, *, block_b=512):
    """x: [B, in_feature] float32. params: dict of [in,out] weights, [1,out] biases."""
    B, F = x.shape
    w1, b1 = params["w1"], params["b1"]
    w2, b2 = params["w2"], params["b2"]
    w3, b3 = params["w3"], params["b3"]
    H = w1.shape[1]

    # bf16 inputs for the MXU (f32 accumulation inside the kernel); halves the
    # HBM->VMEM bytes for x, which dominates this mem-bound kernel.
    xb = x.astype(jnp.bfloat16)
    w1b = w1.astype(jnp.bfloat16)
    w2b = w2.astype(jnp.bfloat16)
    # Pad the final [H,1] layer to lane-dense [H,LANE] (zeros beyond column 0).
    w3p = jnp.zeros((H, LANE), jnp.bfloat16).at[:, :1].set(w3.astype(jnp.bfloat16))
    b3p = jnp.zeros((1, LANE), jnp.float32).at[:, :1].set(b3)

    # Batch tile: multiple of 8 sublanes; pad B up to a whole number of tiles.
    tb = min(int(block_b), _round_up(B, 8))
    B_pad = _round_up(B, tb)
    if B_pad != B:
        xb = jnp.pad(xb, ((0, B_pad - B), (0, 0)))
    grid = (B_pad // tb,)

    const = lambda i: (0, 0)  # weights / biases stay VMEM-resident across steps

    flops = int(2 * B_pad * (F * H + H * H + H * LANE))
    bytes_accessed = int(
        B_pad * F * 2                      # x (bf16 in)
        + B_pad * LANE * 4                 # padded output (f32)
        + (F * H + H * H + H * LANE) * 2   # bf16 weights
        + (2 * H + LANE) * 4               # f32 biases
    )

    y_pad = pl.pallas_call(
        _wdisc_kernel,
        out_shape=jax.ShapeDtypeStruct((B_pad, LANE), jnp.float32),
        grid=grid,
        in_specs=[
            pl.BlockSpec((tb, F), lambda i: (i, 0)),   # x: pipelined over batch
            pl.BlockSpec((F, H), const),               # W1
            pl.BlockSpec((1, H), const),               # b1
            pl.BlockSpec((H, H), const),               # W2
            pl.BlockSpec((1, H), const),               # b2
            pl.BlockSpec((H, LANE), const),            # W3 (lane-padded)
            pl.BlockSpec((1, LANE), const),            # b3 (lane-padded)
        ],
        out_specs=pl.BlockSpec((tb, LANE), lambda i: (i, 0)),
        compiler_params=pltpu.CompilerParams(
            dimension_semantics=("parallel",),         # shard batch over v7x's 2 TCs
        ),
        cost_estimate=pl.CostEstimate(
            flops=flops, transcendentals=0, bytes_accessed=bytes_accessed),
    )(xb, w1b, b1, w2b, b2, w3p, b3p)

    # Drop the batch padding and the lane padding of the final layer.
    return y_pad[:B, :1]


def init_params(key, in_feature, hidden_size):
    """Xavier-normal weights, zero biases (matches init_weights for Linear)."""
    k1, k2, k3 = jax.random.split(key, 3)

    def xavier(k, fan_in, fan_out):
        std = float(np.sqrt(2.0 / (fan_in + fan_out)))
        # Stored as [in, out] (transposed vs. PyTorch's [out, in]) so the
        # kernel computes x @ W directly.
        return jax.random.normal(k, (fan_in, fan_out), jnp.float32) * std

    return {
        "w1": xavier(k1, in_feature, hidden_size),
        "b1": jnp.zeros((1, hidden_size), jnp.float32),
        "w2": xavier(k2, hidden_size, hidden_size),
        "b2": jnp.zeros((1, hidden_size), jnp.float32),
        "w3": xavier(k3, hidden_size, 1),
        "b3": jnp.zeros((1, 1), jnp.float32),
    }


def _reference_forward(x, p):
    # Reference uses the same bf16-rounded inputs as the kernel (f32 math),
    # since the kernel intentionally feeds the MXU bf16 operands.
    f32 = lambda a: a.astype(jnp.bfloat16).astype(jnp.float32)
    h1 = jnp.maximum(f32(x) @ f32(p["w1"]) + p["b1"], 0.0)
    h2 = jnp.maximum(f32(h1) @ f32(p["w2"]) + p["b2"], 0.0)
    return f32(h2) @ f32(p["w3"]) + p["b3"]          # no sigmoid in forward


if __name__ == "__main__":
    B, IN_FEATURE, HIDDEN = 8, 32, 32

    key = jax.random.PRNGKey(0)
    kx, kp = jax.random.split(key)
    x = jax.random.normal(kx, (B, IN_FEATURE), jnp.float32)
    params = init_params(kp, IN_FEATURE, HIDDEN)

    # TODO(synk): training-mode Dropout(0.5) (stochastic masking) is not
    # implemented; the inference forward treats dropout as identity.

    y = wasserstein_discriminator_forward(x, params)
    y = jax.block_until_ready(y)

    y_ref = _reference_forward(x, params)
    assert y.shape == (B, 1)
    np.testing.assert_allclose(np.asarray(y), np.asarray(y_ref), rtol=2e-2, atol=2e-2)

    print("KERNEL_OK")
</pallas_src>

<mosaic_0001>
module attributes {stable_mosaic.version = 11 : i64} {
  func.func @_wdisc_kernel(%arg0: i32, %arg1: memref<8x32xbf16, #tpu.memory_space<vmem>>, %arg2: memref<32x32xbf16, #tpu.memory_space<vmem>>, %arg3: memref<1x32xf32, #tpu.memory_space<vmem>>, %arg4: memref<32x32xbf16, #tpu.memory_space<vmem>>, %arg5: memref<1x32xf32, #tpu.memory_space<vmem>>, %arg6: memref<32x128xbf16, #tpu.memory_space<vmem>>, %arg7: memref<1x128xf32, #tpu.memory_space<vmem>>, %arg8: memref<8x128xf32, #tpu.memory_space<vmem>>) attributes {dimension_semantics = [#tpu.dimension_semantics<parallel>], iteration_bounds = array<i64: 1>, scalar_prefetch = 0 : i64, scratch_operands = 0 : i64, tpu.core_type = #tpu.core_type<tc>, window_params = [{transform_indices = @transform_0, window_bounds = array<i64: 8, 32>}, {pipeline_mode = #tpu.pipeline_mode<synchronous>, transform_indices = @transform_1, window_bounds = array<i64: 32, 32>}, {pipeline_mode = #tpu.pipeline_mode<synchronous>, transform_indices = @transform_2, window_bounds = array<i64: 1, 32>}, {pipeline_mode = #tpu.pipeline_mode<synchronous>, transform_indices = @transform_3, window_bounds = array<i64: 32, 32>}, {pipeline_mode = #tpu.pipeline_mode<synchronous>, transform_indices = @transform_4, window_bounds = array<i64: 1, 32>}, {pipeline_mode = #tpu.pipeline_mode<synchronous>, transform_indices = @transform_5, window_bounds = array<i64: 32, 128>}, {pipeline_mode = #tpu.pipeline_mode<synchronous>, transform_indices = @transform_6, window_bounds = array<i64: 1, 128>}, {transform_indices = @transform_7, window_bounds = array<i64: 8, 128>}]} {
    %c0 = arith.constant 0 : index
    %c0_0 = arith.constant 0 : index
    %0 = vector.load %arg1[%c0, %c0_0] : memref<8x32xbf16, #tpu.memory_space<vmem>>, vector<8x32xbf16>
    %c0_1 = arith.constant 0 : index
    %c0_2 = arith.constant 0 : index
    %1 = vector.load %arg2[%c0_1, %c0_2] : memref<32x32xbf16, #tpu.memory_space<vmem>>, vector<32x32xbf16>
    %cst = arith.constant dense<0.000000e+00> : vector<8x32xf32>
    %2 = tpu.matmul %0, %1, %cst {dimension_numbers = #tpu.dot_dimension_numbers<[1], [0], [0], [1], [0, 0, 1, 1], [], []>} : vector<8x32xbf16>, vector<32x32xbf16>, vector<8x32xf32> -> vector<8x32xf32>
    %c0_3 = arith.constant 0 : index
    %c0_4 = arith.constant 0 : index
    %3 = vector.load %arg3[%c0_3, %c0_4] : memref<1x32xf32, #tpu.memory_space<vmem>>, vector<1x32xf32>
    %4 = vector.broadcast %3 : vector<1x32xf32> to vector<8x32xf32>
    %5 = arith.addf %2, %4 : vector<8x32xf32>
    %cst_5 = arith.constant 0.000000e+00 : f32
    %6 = vector.broadcast %cst_5 : f32 to vector<8x32xf32>
    %7 = arith.maximumf %5, %6 : vector<8x32xf32>
    %8 = arith.truncf %7 : vector<8x32xf32> to vector<8x32xbf16>
    %c0_6 = arith.constant 0 : index
    %c0_7 = arith.constant 0 : index
    %9 = vector.load %arg4[%c0_6, %c0_7] : memref<32x32xbf16, #tpu.memory_space<vmem>>, vector<32x32xbf16>
    %cst_8 = arith.constant dense<0.000000e+00> : vector<8x32xf32>
    %10 = tpu.matmul %8, %9, %cst_8 {dimension_numbers = #tpu.dot_dimension_numbers<[1], [0], [0], [1], [0, 0, 1, 1], [], []>} : vector<8x32xbf16>, vector<32x32xbf16>, vector<8x32xf32> -> vector<8x32xf32>
    %c0_9 = arith.constant 0 : index
    %c0_10 = arith.constant 0 : index
    %11 = vector.load %arg5[%c0_9, %c0_10] : memref<1x32xf32, #tpu.memory_space<vmem>>, vector<1x32xf32>
    %12 = vector.broadcast %11 : vector<1x32xf32> to vector<8x32xf32>
    %13 = arith.addf %10, %12 : vector<8x32xf32>
    %cst_11 = arith.constant 0.000000e+00 : f32
    %14 = vector.broadcast %cst_11 : f32 to vector<8x32xf32>
    %15 = arith.maximumf %13, %14 : vector<8x32xf32>
    %16 = arith.truncf %15 : vector<8x32xf32> to vector<8x32xbf16>
    %c0_12 = arith.constant 0 : index
    %c0_13 = arith.constant 0 : index
    %17 = vector.load %arg6[%c0_12, %c0_13] : memref<32x128xbf16, #tpu.memory_space<vmem>>, vector<32x128xbf16>
    %cst_14 = arith.constant dense<0.000000e+00> : vector<8x128xf32>
    %18 = tpu.matmul %16, %17, %cst_14 {dimension_numbers = #tpu.dot_dimension_numbers<[1], [0], [0], [1], [0, 0, 1, 1], [], []>} : vector<8x32xbf16>, vector<32x128xbf16>, vector<8x128xf32> -> vector<8x128xf32>
    %c0_15 = arith.constant 0 : index
    %c0_16 = arith.constant 0 : index
    %19 = vector.load %arg7[%c0_15, %c0_16] : memref<1x128xf32, #tpu.memory_space<vmem>>, vector<1x128xf32>
    %20 = vector.broadcast %19 : vector<1x128xf32> to vector<8x128xf32>
    %21 = arith.addf %18, %20 : vector<8x128xf32>
    %c0_17 = arith.constant 0 : index
    %c0_18 = arith.constant 0 : index
    %22 = vector.load %arg8[%c0_17, %c0_18] : memref<8x128xf32, #tpu.memory_space<vmem>>, vector<8x128xf32>
    tpu.vector_store %arg8[%c0_17, %c0_18], %21 {strides = array<i32>} : memref<8x128xf32, #tpu.memory_space<vmem>>, vector<8x128xf32>,
    return
  }
  func.func @transform_0(%arg0: i32) -> (i32, i32) {
    %c0_i32 = arith.constant 0 : i32
    %c0_i32_0 = arith.constant 0 : i32
    return %arg0, %c0_i32 : i32, i32
  }
  func.func @transform_1(%arg0: i32) -> (i32, i32) {
    %c0_i32 = arith.constant 0 : i32
    %c0_i32_0 = arith.constant 0 : i32
    %c0_i32_1 = arith.constant 0 : i32
    return %c0_i32, %c0_i32_0 : i32, i32
  }
  func.func @transform_2(%arg0: i32) -> (i32, i32) {
    %c0_i32 = arith.constant 0 : i32
    %c0_i32_0 = arith.constant 0 : i32
    %c0_i32_1 = arith.constant 0 : i32
    return %c0_i32, %c0_i32_0 : i32, i32
  }
  func.func @transform_3(%arg0: i32) -> (i32, i32) {
    %c0_i32 = arith.constant 0 : i32
    %c0_i32_0 = arith.constant 0 : i32
    %c0_i32_1 = arith.constant 0 : i32
    return %c0_i32, %c0_i32_0 : i32, i32
  }
  func.func @transform_4(%arg0: i32) -> (i32, i32) {
    %c0_i32 = arith.constant 0 : i32
    %c0_i32_0 = arith.constant 0 : i32
    %c0_i32_1 = arith.constant 0 : i32
    return %c0_i32, %c0_i32_0 : i32, i32
  }
  func.func @transform_5(%arg0: i32) -> (i32, i32) {
    %c0_i32 = arith.constant 0 : i32
    %c0_i32_0 = arith.constant 0 : i32
    %c0_i32_1 = arith.constant 0 : i32
    return %c0_i32, %c0_i32_0 : i32, i32
  }
  func.func @transform_6(%arg0: i32) -> (i32, i32) {
    %c0_i32 = arith.constant 0 : i32
    %c0_i32_0 = arith.constant 0 : i32
    %c0_i32_1 = arith.constant 0 : i32
    return %c0_i32, %c0_i32_0 : i32, i32
  }
  func.func @transform_7(%arg0: i32) -> (i32, i32) {
    %c0_i32 = arith.constant 0 : i32
    %c0_i32_0 = arith.constant 0 : i32
    return %arg0, %c0_i32 : i32, i32
  }
}

</mosaic_0001>

<bundles_post_ra>
// kernel: tpu_custom_call.1
= control target key start
LH: loop header
LB: loop body
LE: loop exit
PB: predicated region body
PF: predicated region fallthrough
CT: control target
= control target key end

     0   :  { %12 = vsyncpa [#allocation3], 0  ;;  %s561_s0 = inlined_call_operand.hbm [shape: bf16[8,32], index: 0, kind: input, shape index: {}]   ;;  %s562_s1 = inlined_call_operand.hbm [shape: bf16[32,32], index: 1, kind: input, shape index: {}]   ;;  %s563_s2 = inlined_call_operand.vmem [shape: f32[1,32], index: 2, kind: input, shape index: {}]   ;;  %s564_s3 = inlined_call_operand.hbm [shape: bf16[32,32], index: 3, kind: input, shape index: {}]   ;;  %s565_s4 = inlined_call_operand.vmem [shape: f32[1,32], index: 4, kind: input, shape index: {}]   ;;  %s566_s5 = inlined_call_operand.vmem [shape: bf16[32,128], index: 5, kind: input, shape index: {}]   ;;  %s567_s6 = inlined_call_operand.vmem [shape: f32[1,128], index: 6, kind: input, shape index: {}]   ;;  %s568_s7 = inlined_call_operand.hbm [shape: f32[8,128], index: 7, kind: output, shape index: {}]  }
   0x1   :  { %13 = vsyncpa [#allocation6], 0 }
   0x2   :  { %14 = vsyncpa [#allocation4], 0  ;;  %s441_s24 = smov [#allocation5]   ;;  %s347_s28 = scalar_lea.hbm %s562_s1, 256 }
   0x3   :  { %s30_s25 = sshll.u32 %s441_s24, 4  ;;  %p348_p0 = scmp.ne.s32.totalorder %s562_s1, %s347_s28  ;;  %s31_s25 = int_to_ptr.vmem [resolvable:$true] %s30_s25 }
   0x4   :  { %p351_p1 = scmp.lt.u32.totalorder %s347_s28, %s562_s1 }
   0x6   :  { %p353_p2 = pnand %p351_p1, %p348_p0 }
   0x8   :  { %356 = shalt.err (!%p353_p2)
}
   0x9   :  { %s357_s10 = scalar_lea.vmem %s31_s25, 256  ;;  %p362_p4 = scmp.lt.s32.totalorder %s31_s25, %s31_s25 }
   0xa   :  { %p358_p3 = scmp.ne.s32.totalorder %s31_s25, %s357_s10  ;;  %p363_p5 = scmp.lt.s32.totalorder %s357_s10, %s357_s10 }
   0xc   :  { %p364_p6 = por %p363_p5, %p362_p4 }
   0xe   :  { %p365_p7 = pnand %p364_p6, %p358_p3 }
  0x10   :  { %368 = shalt.err (!%p365_p7)
}
  0x11   :  { %s442_s11 = smov 64   ;;  %s443_s12 = smov 4  }
  0x12   :  { %36 = dma.hbm_to_vmem [thread:$0]  %s562_s1, 256, %s31_s25, [#allocation6], %s442_s11, %s442_s11, %s443_s12  }
  0x13   :  { %s444_s15 = smov [#allocation2]   ;;  %s445_s17 = smov [#allocation7]  }
  0x14   :  { %s21_s16 = sshll.u32 %s444_s15, 4  ;;  %s44_s18 = sshll.u32 %s445_s17, 4  ;;  %s22_s16 = int_to_ptr.vmem [resolvable:$true] %s21_s16  ;;  %s45_s18 = int_to_ptr.vmem [resolvable:$true] %s44_s18 }
  0x15   :  { %s369_s21 = scalar_lea.hbm %s561_s0, 64 }
  0x16   :  { %p370_p8 = scmp.ne.s32.totalorder %s561_s0, %s369_s21  ;;  %p373_p9 = scmp.lt.u32.totalorder %s369_s21, %s561_s0 }
  0x18   :  { %p375_p10 = pnand %p373_p9, %p370_p8 }
  0x1a   :  { %378 = shalt.err (!%p375_p10)
}
  0x1b   :  { %s379_s1 = scalar_lea.vmem %s22_s16, 64  ;;  %p384_p12 = scmp.lt.s32.totalorder %s22_s16, %s22_s16 }
  0x1c   :  { %p380_p11 = scmp.ne.s32.totalorder %s22_s16, %s379_s1  ;;  %p385_p13 = scmp.lt.s32.totalorder %s379_s1, %s379_s1 }
  0x1e   :  { %p386_p0 = por %p385_p13, %p384_p12 }
  0x20   :  { %p387_p1 = pnand %p386_p0, %p380_p11 }
  0x22   :  { %390 = shalt.err (!%p387_p1)
}
  0x23   :  { %24 = dma.hbm_to_vmem [thread:$0]  %s561_s0, 64, %s22_s16, [#allocation3]  }
  0x24   :  { %s391_s30 = scalar_lea.hbm %s564_s3, 256 }
  0x25   :  { %p392_p2 = scmp.ne.s32.totalorder %s564_s3, %s391_s30  ;;  %p395_p3 = scmp.lt.u32.totalorder %s391_s30, %s564_s3 }
  0x27   :  { %p397_p4 = pnand %p395_p3, %p392_p2 }
  0x29   :  { %400 = shalt.err (!%p397_p4)
}
  0x2a   :  { %s401_s14 = scalar_lea.vmem %s45_s18, 256  ;;  %p406_p6 = scmp.lt.s32.totalorder %s45_s18, %s45_s18 }
  0x2b   :  { %p402_p5 = scmp.ne.s32.totalorder %s45_s18, %s401_s14  ;;  %p407_p7 = scmp.lt.s32.totalorder %s401_s14, %s401_s14 }
  0x2d   :  { %p408_p8 = por %p407_p7, %p406_p6 }
  0x2f   :  { %p409_p9 = pnand %p408_p8, %p402_p5 }
  0x31   :  { %412 = shalt.err (!%p409_p9)
}
  0x32   :  { %50 = dma.hbm_to_vmem [thread:$0]  %s564_s3, 256, %s45_s18, [#allocation6], %s442_s11, %s442_s11, %s443_s12  }
  0x33   :  { %435 = dma.done.wait [#allocation3], 64  }
  0x34   :  { %436 = vsyncadd [#allocation3], 4294967232 }
  0x35   :  { %437 = dma.done.wait [#allocation6], 512  }
  0x36   :  { %438 = vsyncadd [#allocation6], 4294966784  ;;  %v446_v0 = vmov 0.0   ;;  %vm447_vm0 = vmmov 0   ;;  %v341_v1 = vld [vmem:[#allocation5] sm:$0xff]   ;;  %v342_v2 = vld [vmem:[#allocation5 + $0x8] sm:$0xff]  }
  0x37   :  { %309 = vmatprep.subr.bf16.mxu0 %v446_v0  ;;  %313 = vmatprep.mubr.msk.bf16.mxu0 %vm447_vm0, %v446_v0  ;;  %v67_v3 = vld [vmem:[#allocation2] sm:$0xf]  ;;  %vm91_vm1 = vcmask 261120   ;;  %v343_v4 = vld [vmem:[#allocation7] sm:$0xff]   ;;  %v288_v7 = vld [vmem:[%s563_s2] ss:$0 sm:$0xff] }
  0x38   :  { %317 = vmatprep.subr.bf16.mxu1 %v446_v0  ;;  %321 = vmatprep.mubr.msk.bf16.mxu1 %vm447_vm0, %v446_v0  ;;  %v344_v5 = vld [vmem:[#allocation7 + $0x8] sm:$0xff]   ;;  %v345_v6 = vld [vmem:[%s566_s5] sm:$0xff]   ;;  %s448_s22 = smov [#allocation8]  }
  0x39   :  { %310 = vmatpush3.bf16.msra.mxu0 %v341_v1  ;;  %318 = vmatpush3.bf16.msra.mxu1 %v343_v4  ;;  %v346_v15 = vld [vmem:[%s566_s5 + $0x8] sm:$0xff]   ;;  %v292_v16 = vld [vmem:[%s565_s4] ss:$0 sm:$0xff]  ;;  %s278_s5 = sshll.u32 %s448_s22, 4  ;;  %s279_s5 = int_to_ptr.vmem [resolvable:$true] %s278_s5 }
  0x3a   :  { %311 = vmatprep.subr.bf16.mxu0 %v446_v0  ;;  %319 = vmatprep.subr.bf16.mxu1 %v446_v0  ;;  %v296_v24 = vld [vmem:[%s567_s6] ss:$0 sm:$0xff]  ;;  %s413_s4 = scalar_lea.vmem %s279_s5, 128  ;;  %p418_p11 = scmp.lt.s32.totalorder %s279_s5, %s279_s5 }
  0x3b   :  { %p414_p10 = scmp.ne.s32.totalorder %s279_s5, %s413_s4  ;;  %p419_p12 = scmp.lt.s32.totalorder %s413_s4, %s413_s4 }
  0x3d   :  { %312 = vmatpush3.bf16.msra.mxu0 %v342_v2  ;;  %320 = vmatpush3.bf16.msra.mxu1 %v344_v5  ;;  %p420_p13 = por %p419_p12, %p418_p11 }
  0x3e   :  { %325 = vmatprep.subr.bf16.mxu0 %v446_v0 }
  0x3f   :  { %p421_p0 = pnand %p420_p13, %p414_p10 }
  0x40   :  { %314 = vmatmul.mubr.msk.bf16.vlgmr.msra.gmra.mrb[0].mxu0 %vm91_vm1, %v67_v3 }
  0x41   :  { %329 = vmatprep.mubr.msk.bf16.mxu0 %vm447_vm0, %v446_v0  ;;  %326 = vmatpush3.bf16.msra.mxu0 %v345_v6 }
  0x42   :  { %327 = vmatprep.subr.bf16.mxu0 %v446_v0 }
  0x45   :  { %328 = vmatpush3.bf16.msra.mxu0 %v346_v15 }
 0x113   :  { %v129_v8 = vpop.f32.mrb[0].mxu0 }
 0x114   :  { %v130_v9 = vadd.f32 %v288_v7, %v129_v8  ;;  %v315_v10 = vpop.f32.mrb[1].mxu0 }
 0x115   :  { %v132_v11 = vpop.f32.mrb[2].mxu0 }
 0x116   :  { %v135_v12 = vmax.f32 %v130_v9, 0.0  ;;  %v316_v13 = vpop.f32.mrb[3].mxu0 }
 0x118   :  { %v136_v14 = vpack.c.bf16 %v135_v12, %v135_v12 }
 0x11a   :  { %322 = vmatmul.mubr.msk.bf16.vlgmr.msra.gmra.mrb[0].mxu1 %vm91_vm1, %v136_v14 }
 0x1ed   :  { %v197_v17 = vpop.f32.mrb[0].mxu1 }
 0x1ee   :  { %v198_v18 = vadd.f32 %v292_v16, %v197_v17  ;;  %v323_v19 = vpop.f32.mrb[1].mxu1 }
 0x1ef   :  { %v200_v20 = vpop.f32.mrb[2].mxu1 }
 0x1f0   :  { %v203_v21 = vmax.f32 %v198_v18, 0.0  ;;  %v324_v22 = vpop.f32.mrb[3].mxu1 }
 0x1f2   :  { %v204_v23 = vpack.c.bf16 %v203_v21, %v203_v21 }
 0x1f4   :  { %330 = vmatmul.mubr.msk.bf16.vlgmr.msra.gmra.mrb[4].mxu0 %vm91_vm1, %v204_v23 }
 0x2c7   :  { %v265_v25 = vpop.f32.mrb[4].mxu0 }
 0x2c8   :  { %v266_v26 = vadd.f32 %v296_v24, %v265_v25  ;;  %v331_v27 = vpop.f32.mrb[5].mxu0 }
 0x2c9   :  { %v268_v28 = vpop.f32.mrb[6].mxu0 }
 0x2ca   :  { %271 = vst [vmem:[#allocation8] sm:$0xff] %v266_v26  ;;  %v332_v29 = vpop.f32.mrb[7].mxu0 }
 0x2cb   :  { %424 = shalt.err (!%p421_p0)
}
 0x2cc   :  { %s425_s6 = scalar_lea.hbm %s568_s7, 128 }
 0x2cd   :  { %p426_p1 = scmp.ne.s32.totalorder %s568_s7, %s425_s6  ;;  %p429_p2 = scmp.lt.u32.totalorder %s425_s6, %s568_s7 }
 0x2cf   :  { %p431_p3 = pnand %p429_p2, %p426_p1 }
 0x2d1   :  { %434 = shalt.err (!%p431_p3)
}
 0x2d2   :  { %281 = dma.vmem_to_hbm [thread:$0]  %s279_s5, 128, %s568_s7, [#allocation4]  }
 0x2d3   :  { %439 = dma.done.wait [#allocation4], 128  }
 0x2d4   :  { %440 = vsyncadd [#allocation4], 4294967168 }
 0x2d5   :  { %285 = vsyncpa [#allocation3], 1 }
 0x2d6   :  { %286 = vsyncpa [#allocation6], 1 }
 0x2d7   :  { %287 = vsyncpa [#allocation4], 1 }

</bundles_post_ra>
